<compile_context>
chip_gen: v7x
topology: tpu7x:2x2x1
jax: 0.10.0
libtpu: 0.0.40
codegen_flags: <defaults>
</compile_context>

<pallas_src>
import functools

import jax
import jax.numpy as jnp
from jax import lax
from jax.experimental import pallas as pl
from jax.experimental.pallas import tpu as pltpu


def critic_kernel(x_ref, w1_ref, b1_ref, w2t_ref, b2_ref, q_ref):
    """Fused: q[tile] = relu(x @ W1 + b1) @ W2 + b2, stored lane-dense as (1, tb)."""
    # First linear layer: (tb, F) @ (F, node) -> (tb, node), f32 accumulation.
    h = jnp.dot(x_ref[...], w1_ref[...], preferred_element_type=jnp.float32)
    h = jnp.maximum(h + b1_ref[...], 0.0)           # b1 (1, node) broadcasts over batch
    # Output head as a trans_b matmul so the MXU emits a lane-dense (1, tb)
    # tile directly (batch on lanes): (1, node) . (tb, node)^T -> (1, tb).
    qt = lax.dot_general(
        w2t_ref[...], h.astype(w2t_ref.dtype),
        dimension_numbers=(((1,), (1,)), ((), ())),
        preferred_element_type=jnp.float32,
    )
    q_ref[...] = (qt + b2_ref[0, 0])[None].astype(q_ref.dtype)   # (1, 1, tb)


@functools.partial(jax.jit, static_argnames=("batch_tile",))
def critic_forward(state, action, w1, b1, w2, b2, *, batch_tile=256):
    """q = relu(cat([state, action]) @ W1 + b1) @ W2 + b2.

    state:  (B, S) f32     action: (B, A) f32
    w1:     (S + A, node)  b1: (node,)
    w2:     (node, 1)      b2: (1,)
    returns q: (B, 1) f32
    """
    B, S = state.shape
    _, A = action.shape
    F = S + A
    node = w1.shape[1]
    assert w1.shape[0] == F

    # Fuse the concat in the wrapper; cast matmul operands to bf16 (f32 accum in-kernel).
    x = jnp.concatenate([state, action], axis=-1).astype(jnp.bfloat16)
    w1_bf = w1.astype(jnp.bfloat16)
    w2t_bf = w2.reshape(1, node).astype(jnp.bfloat16)    # (1, node) for the trans_b head
    b1_2d = b1.reshape(1, node).astype(jnp.float32)
    b2_2d = b2.reshape(1, 1).astype(jnp.float32)

    # Batch tile: big enough to amortize per-step overhead, multiple of 128 so the
    # lane-dense output block stays legal when the grid has more than one step.
    if B <= batch_tile:
        tb = B
    else:
        assert batch_tile % 128 == 0, "batch_tile must be a multiple of 128"
        tb = batch_tile
    grid_b = pl.cdiv(B, tb)
    b_pad = grid_b * tb
    if b_pad != B:
        x = jnp.pad(x, ((0, b_pad - B), (0, 0)))         # padded rows are discarded below

    q_slab = pl.pallas_call(
        critic_kernel,
        out_shape=jax.ShapeDtypeStruct((grid_b, 1, tb), jnp.float32),
        grid_spec=pltpu.PrefetchScalarGridSpec(
            num_scalar_prefetch=0,
            grid=(grid_b,),
            in_specs=[
                pl.BlockSpec((tb, F), lambda i: (i, 0)),            # x tile (bf16)
                pl.BlockSpec((F, node), lambda i: (0, 0)),          # W1 (grid-invariant)
                pl.BlockSpec((1, node), lambda i: (0, 0)),          # b1 (f32)
                pl.BlockSpec((1, node), lambda i: (0, 0)),          # W2^T (bf16)
                pl.BlockSpec(memory_space=pltpu.MemorySpace.SMEM),  # b2 scalar
            ],
            out_specs=pl.BlockSpec((1, 1, tb), lambda i: (i, 0, 0)),
        ),
        compiler_params=pltpu.CompilerParams(
            dimension_semantics=("parallel",),   # megacore-shardable on v7x
        ),
    )(x, w1_bf, b1_2d, w2t_bf, b2_2d)

    # (grid, 1, tb) -> (B, 1); batch row g*tb + j lives at q_slab[g, 0, j].
    return q_slab.reshape(b_pad, 1)[:B]


def init_critic_params(key, state_dim, action_dim, node):
    """Deterministic init matching torch.nn.Linear's U(-1/sqrt(fan_in), 1/sqrt(fan_in))."""
    k1, k2, k3, k4 = jax.random.split(key, 4)
    fan1 = state_dim + action_dim
    bound1 = 1.0 / jnp.sqrt(fan1)
    w1 = jax.random.uniform(k1, (fan1, node), jnp.float32, -bound1, bound1)
    b1 = jax.random.uniform(k2, (node,), jnp.float32, -bound1, bound1)
    bound2 = 1.0 / jnp.sqrt(node)
    w2 = jax.random.uniform(k3, (node, 1), jnp.float32, -bound2, bound2)
    b2 = jax.random.uniform(k4, (1,), jnp.float32, -bound2, bound2)
    return w1, b1, w2, b2


def critic_reference(state, action, w1, b1, w2, b2):
    """Pure-JAX f32 reference of the PyTorch forward (for correctness check)."""
    cated = jnp.concatenate([state, action], axis=-1)
    h = jnp.maximum(cated @ w1 + b1, 0.0)
    return h @ w2 + b2


if __name__ == "__main__":
    # Vector state -> Identity preprocess; replay-batch-sized B gives a 2-step grid.
    B, STATE_DIM, ACTION_DIM, NODE = 512, 16, 4, 256   # hidden_n=1, node=256 (defaults)

    key = jax.random.PRNGKey(0)
    ks, ka, kp = jax.random.split(key, 3)
    state = jax.random.normal(ks, (B, STATE_DIM), jnp.float32)
    action = jax.random.normal(ka, (B, ACTION_DIM), jnp.float32)
    w1, b1, w2, b2 = init_critic_params(kp, STATE_DIM, ACTION_DIM, NODE)

    q = critic_forward(state, action, w1, b1, w2, b2)
    q = jax.block_until_ready(q)

    q_ref = critic_reference(state, action, w1, b1, w2, b2)
    assert q.shape == (B, 1)
    # bf16 operands with f32 accumulation -> compare against the f32 reference with a
    # tolerance covering the bf16 rounding of x / W1 / W2 / h (error ~1e-3 abs here).
    assert jnp.allclose(q, q_ref, atol=5e-2, rtol=5e-2), "Pallas kernel mismatch vs reference"

    # TODO(synk): visual_embedding (CNN preprocess for 3-D state shapes) and NoisyLinear are
    # not exercised; this implements the vector-state (nn.Identity), non-noisy path.
    print("KERNEL_OK")
</pallas_src>

<mosaic_0001>
module attributes {stable_mosaic.version = 11 : i64} {
  func.func @critic_kernel(%arg0: i32, %arg1: memref<256x20xbf16, #tpu.memory_space<vmem>>, %arg2: memref<20x256xbf16, #tpu.memory_space<vmem>>, %arg3: memref<1x256xf32, #tpu.memory_space<vmem>>, %arg4: memref<1x256xbf16, #tpu.memory_space<vmem>>, %arg5: memref<1x1xf32, #tpu.memory_space<smem>>, %arg6: memref<1x1x256xf32, #tpu.memory_space<vmem>>) attributes {dimension_semantics = [#tpu.dimension_semantics<parallel>], iteration_bounds = array<i64: 2>, scalar_prefetch = 0 : i64, scratch_operands = 0 : i64, tpu.core_type = #tpu.core_type<tc>, window_params = [{transform_indices = @transform_0, window_bounds = array<i64: 256, 20>}, {pipeline_mode = #tpu.pipeline_mode<synchronous>, transform_indices = @transform_1, window_bounds = array<i64: 20, 256>}, {pipeline_mode = #tpu.pipeline_mode<synchronous>, transform_indices = @transform_2, window_bounds = array<i64: 1, 256>}, {pipeline_mode = #tpu.pipeline_mode<synchronous>, transform_indices = @transform_3, window_bounds = array<i64: 1, 256>}, {transform_indices = @transform_4, window_bounds = array<i64: 1, 1>}, {transform_indices = @transform_5, window_bounds = array<i64: 1, 1, 256>}]} {
    %c0 = arith.constant 0 : index
    %c0_0 = arith.constant 0 : index
    %0 = vector.load %arg1[%c0, %c0_0] : memref<256x20xbf16, #tpu.memory_space<vmem>>, vector<256x20xbf16>
    %c0_1 = arith.constant 0 : index
    %c0_2 = arith.constant 0 : index
    %1 = vector.load %arg2[%c0_1, %c0_2] : memref<20x256xbf16, #tpu.memory_space<vmem>>, vector<20x256xbf16>
    %cst = arith.constant dense<0.000000e+00> : vector<256x256xf32>
    %2 = tpu.matmul %0, %1, %cst {dimension_numbers = #tpu.dot_dimension_numbers<[1], [0], [0], [1], [0, 0, 1, 1], [], []>} : vector<256x20xbf16>, vector<20x256xbf16>, vector<256x256xf32> -> vector<256x256xf32>
    %c0_3 = arith.constant 0 : index
    %c0_4 = arith.constant 0 : index
    %3 = vector.load %arg3[%c0_3, %c0_4] : memref<1x256xf32, #tpu.memory_space<vmem>>, vector<1x256xf32>
    %4 = vector.broadcast %3 : vector<1x256xf32> to vector<256x256xf32>
    %5 = arith.addf %2, %4 : vector<256x256xf32>
    %cst_5 = arith.constant 0.000000e+00 : f32
    %6 = vector.broadcast %cst_5 : f32 to vector<256x256xf32>
    %7 = arith.maximumf %5, %6 : vector<256x256xf32>
    %c0_6 = arith.constant 0 : index
    %c0_7 = arith.constant 0 : index
    %8 = vector.load %arg4[%c0_6, %c0_7] : memref<1x256xbf16, #tpu.memory_space<vmem>>, vector<1x256xbf16>
    %9 = arith.truncf %7 : vector<256x256xf32> to vector<256x256xbf16>
    %cst_8 = arith.constant dense<0.000000e+00> : vector<1x256xf32>
    %10 = tpu.matmul %8, %9, %cst_8 {dimension_numbers = #tpu.dot_dimension_numbers<[1], [1], [0], [0], [0, 0, 1, 0], [], []>} : vector<1x256xbf16>, vector<256x256xbf16>, vector<1x256xf32> -> vector<1x256xf32>
    %c0_9 = arith.constant 0 : index
    %c0_10 = arith.constant 0 : index
    %11 = memref.load %arg5[%c0_9, %c0_10] : memref<1x1xf32, #tpu.memory_space<smem>>
    %12 = vector.broadcast %11 : f32 to vector<1x256xf32>
    %13 = arith.addf %10, %12 : vector<1x256xf32>
    %14 = vector.shape_cast %13 : vector<1x256xf32> to vector<1x1x256xf32>
    %c0_11 = arith.constant 0 : index
    %c0_12 = arith.constant 0 : index
    %c0_13 = arith.constant 0 : index
    %15 = vector.load %arg6[%c0_11, %c0_12, %c0_13] : memref<1x1x256xf32, #tpu.memory_space<vmem>>, vector<1x1x256xf32>
    tpu.vector_store %arg6[%c0_11, %c0_12, %c0_13], %14 {strides = array<i32>} : memref<1x1x256xf32, #tpu.memory_space<vmem>>, vector<1x1x256xf32>,
    return
  }
  func.func @transform_0(%arg0: i32) -> (i32, i32) {
    %c0_i32 = arith.constant 0 : i32
    %c0_i32_0 = arith.constant 0 : i32
    return %arg0, %c0_i32 : i32, i32
  }
  func.func @transform_1(%arg0: i32) -> (i32, i32) {
    %c0_i32 = arith.constant 0 : i32
    %c0_i32_0 = arith.constant 0 : i32
    %c0_i32_1 = arith.constant 0 : i32
    return %c0_i32, %c0_i32_0 : i32, i32
  }
  func.func @transform_2(%arg0: i32) -> (i32, i32) {
    %c0_i32 = arith.constant 0 : i32
    %c0_i32_0 = arith.constant 0 : i32
    %c0_i32_1 = arith.constant 0 : i32
    return %c0_i32, %c0_i32_0 : i32, i32
  }
  func.func @transform_3(%arg0: i32) -> (i32, i32) {
    %c0_i32 = arith.constant 0 : i32
    %c0_i32_0 = arith.constant 0 : i32
    %c0_i32_1 = arith.constant 0 : i32
    return %c0_i32, %c0_i32_0 : i32, i32
  }
  func.func @transform_4(%arg0: i32) -> (i32, i32) {
    %c0_i32 = arith.constant 0 : i32
    %c0_i32_0 = arith.constant 0 : i32
    %c0_i32_1 = arith.constant 0 : i32
    return %c0_i32, %c0_i32_0 : i32, i32
  }
  func.func @transform_5(%arg0: i32) -> (i32, i32, i32) {
    %c0_i32 = arith.constant 0 : i32
    %c0_i32_0 = arith.constant 0 : i32
    %c0_i32_1 = arith.constant 0 : i32
    return %arg0, %c0_i32, %c0_i32_0 : i32, i32, i32
  }
}

</mosaic_0001>

<bundles_post_ra>
// kernel: critic_forward.1
= control target key start
LH: loop header
LB: loop body
LE: loop exit
PB: predicated region body
PF: predicated region fallthrough
CT: control target
= control target key end

     0   :  { %s1322_s0 = inlined_call_operand.vmem [shape: bf16[512,20], index: 0, kind: input, shape index: {}]   ;;  %s1323_s1 = inlined_call_operand.vmem [shape: bf16[20,256], index: 1, kind: input, shape index: {}]   ;;  %s1324_s2 = inlined_call_operand.vmem [shape: f32[1,256], index: 2, kind: input, shape index: {}]   ;;  %s1325_s3 = inlined_call_operand.vmem [shape: bf16[1,256], index: 3, kind: input, shape index: {}]   ;;  %s1326_s4 = inlined_call_operand.<no memory space> [shape: f32[1,1], index: 4, kind: input, shape index: {}]   ;;  %s1327_s5 = inlined_call_operand.hbm [shape: f32[2,1,256], index: 5, kind: output, shape index: {}]  }
   0x1   :  { %10 = sst [smem:[#allocation2]] %s1326_s4 }
   0x2   :  { %11 = vsyncpa [#allocation4], 0 }
   0x3   :  { %13 = vsyncpa [#allocation4 + $0x1], 0  ;;  %s1093_s20 = smov 0   ;;  %s1095_s21 = smov 0  }
   0x4   :  { %s1097_s22 = smov 0   ;;  %s1099_s23 = smov 0  }
   0x5 LB: > { %s879_s4 = sadd.s32 4294967295, %s1055_s23   ;;  %s880_s24 = sadd.s32 4294967294, %s1055_s23   ;;  %s1055_s23 = sphi %s1099_s23, %s1333_s23   ;;  %s1051_s22 = sphi %s1097_s22, %s1332_s22   ;;  %s1047_s21 = sphi %s1095_s21, %s1331_s21   ;;  %s1043_s20 = sphi %s1093_s20, %s1330_s20  }
   0x6   : > { %s1116_s25 = sadd.s32 1, %s1055_s23   ;;  %s136_s26 = sadd.s32 1, %s1051_s22 }
   0x7   : > { %s133_s27 = ssub.s32 %s1055_s23, %s1116_s25  ;;  %p146_p0 = scmp.ne.s32.totalorder %s1051_s22, %s1047_s21 }
   0x8   : > { %p134_p1 = scmp.eq.s32.totalorder %s133_s27, 0  ;;  %p147_p2 = scmp.eq.s32.totalorder %s879_s4, 1 }
   0x9   : > { %p152_p3 = scmp.ne.s32.totalorder %s1047_s21, %s1043_s20  ;;  %p153_p4 = scmp.eq.s32.totalorder %s880_s24, 1 }
   0xa   : > { %s1126_s28 = scalar_select %p134_p1, %s1051_s22, %s136_s26  }
   0xb   : > { %p1128_p5 = por %p147_p2, %p146_p0  ;;  %p1132_p6 = por %p153_p4, %p152_p3 }
   0xc   : > { %p883_p7 = scmp.ge.s32.totalorder %s1055_s23, 1  ;;  %p192_p8 = scmp.lt.s32.totalorder %s1055_s23, 3 }
   0xe   : > { %p193_p9 = pnand %p883_p7, %p192_p8 }
   0xf   : > { %v972_v0 = vld [vmem:[%s1323_s1 + $0x4] ss:$8 sps:$4 sm:$0xff] (!%p193_p9)   ;;  %v974_v1 = vld [vmem:[%s1323_s1] ss:$8 sps:$4 sm:$0xff] (!%p193_p9)   ;;  %v261_v2 = vld [vmem:[%s1323_s1 + $0x10] sm:$0x33] (!%p193_p9)  ;;  %v264_v23 = vlaneseq (!%p193_p9) }
  0x10   : > { %196 = sbr.rel (%p193_p9) target bundleno = 612 (0x264), region = 40  ;;  %vm418_vm0 = vcmask (!%p193_p9), 1041408   ;;  %v1057_v3 = vmov (!%p193_p9), 0   ;;  %s1147_s12 = sshll.u32 (!%p193_p9), %s879_s4, 5  ;;  %425 = vmatprep.subr.bf16.mxu0 (!%p193_p9), %v972_v0  ;;  %v906_v4 = vcombine.high (!%p193_p9), %v261_v2, %v261_v2  ;;  %v905_v5 = vcombine.low (!%p193_p9), %v261_v2, %v261_v2  ;;  %v262_v26 = vld [vmem:[%s1324_s2] sm:$0x3] (!%p193_p9) }
  0x11   : > { %457 = vmatprep.mubr.bf16.mxu0 (!%p193_p9), %v1057_v3  ;;  %p221_p10 = scmp.lt.s32.totalorder (!%p193_p9), %s1147_s12, 63  ;;  %426 = vmatpush1.bf16.msra.mxu0 (!%p193_p9), %v974_v1  ;;  %vm369_vm1 = vcmask (!%p193_p9), 162816   ;;  %v265_v24 = vshrl.u32 (!%p193_p9), %v264_v23, 7  ;;  %v1058_v33 = vmov (!%p193_p9), 1966171168   ;;  %s715_s26 = sld [smem:[#allocation2]] (!%p193_p9) }
  0x12   : > { %907 = vmatprep.subr.msk.bf16.mxu0 (!%p193_p9), %vm418_vm0, %v906_v4  ;;  %v420_v6 = vsel (!%p193_p9), %vm418_vm0, %v905_v5, 0  ;;  %v727_v34 = vunpack.c.l.s4 (!%p193_p9), %v1058_v33  ;;  %v1202_v39 = vld.sshfl [vmem:[%s1325_s3] sm:$0x11 pattern:$0x75316420] (!%p193_p9)  ;;  %s217_s27 = sand.u32 (!%p193_p9), 1, %s1047_s21   ;;  %s1280_s11 = scalar_lea.hbm (!%p193_p9), %s1327_s5, %s1147_s12 }
  0x13   : > { %v266_v25 = vsub.s32 (!%p193_p9), 0, %v265_v24  ;;  %v270_v27 = vsub.s32 (!%p193_p9), 1, %v265_v24  ;;  %v725_v42 = vcombine.high (!%p193_p9), %v1202_v39, %v1202_v39  ;;  %s884_s6 = sshll.u32 (!%p193_p9), %s217_s27, 1  ;;  %vm803_vm2 = vcmp.lt.s32.totalorder (!%p193_p9), %v264_v23, 256  ;;  %s1059_s15 = smov (!%p193_p9), [#allocation3]  }
  0x14   : > { %v728_v40 = vunpack.c.0.s8 (!%p193_p9), %v727_v34  ;;  %s219_s7 = scalar_lea.vmem (!%p193_p9), [#allocation3], %s884_s6  ;;  %s997_s16 = sshll.u32 (!%p193_p9), %s1059_s15, 4  ;;  %s998_s16 = int_to_ptr.vmem [resolvable:$false] %s997_s16 }
  0x15   : > { %428 = vmatpush1.bf16.msra.mxu0 (!%p193_p9), %v420_v6  ;;  %v1192_v28 = vrot.slane (!%p193_p9), %v262_v26, %v266_v25  ;;  %v1194_v29 = vrot.slane (!%p193_p9), %v262_v26, %v270_v27  ;;  %s821_s8 = sshll.u32 (!%p193_p9), %s219_s7, 4  ;;  %s1282_s8 = int_to_ptr.vmem [resolvable:$true] %s821_s8 }
  0x16   : > { %v1207_v45 = vsub.s32 (!%p193_p9), %v728_v40, %v265_v24  ;;  %p1000_p0 = scmp.lt.s32.totalorder (!%p193_p9), %s1282_s8, %s998_s16 }
  0x17   : > { %s222_s13 = scalar_select %p221_p10, %s1147_s12, 63 }
  0x18   : > { %v739_v49 = vrot.slane %v725_v42, %v1207_v45 }
  0x19   : > { %s886_s14 = sshll.u32 %s222_s13, 2  ;;  %s807_s13 = scalar_lea.sflag [#allocation4], %s217_s27 }
  0x1a   : > { %s1154_s17 = scalar_lea.vmem %s1322_s0, %s886_s14  ;;  %774 = vmatprep.mubr.bf16.mxu1 %v739_v49  ;;  %s993_s14 = scalar_lea.vmem %s1282_s8, 32 }
  0x1b   : > { %v977_v7 = vld [vmem:[%s1154_s17] sm:$0xff]   ;;  %v978_v8 = vld [vmem:[%s1154_s17 + $0x8] sm:$0xff]   ;;  %v979_v9 = vld [vmem:[%s1154_s17 + $0x10] sm:$0xff]   ;;  %p994_p11 = scmp.ne.s32.totalorder %s1282_s8, %s993_s14 }
  0x1c   : > { %908 = vmatmul.mubr.msk.bf16.vlgmr.msra.gmra.mrb[0].mxu0 %vm369_vm1, %v977_v7  ;;  %v980_v10 = vld [vmem:[%s1154_s17 + $0x18] sm:$0xff]   ;;  %v981_v11 = vld [vmem:[%s1154_s17 + $0x20] sm:$0xff]   ;;  %v982_v12 = vld [vmem:[%s1154_s17 + $0x28] sm:$0xff]  }
  0x1d   : > { %467 = vmatprep.mubr.bf16.mxu0 %v1057_v3  ;;  %v983_v13 = vld [vmem:[%s1154_s17 + $0x30] sm:$0xff]   ;;  %v984_v14 = vld [vmem:[%s1154_s17 + $0x38] sm:$0xff]   ;;  %v985_v15 = vld [vmem:[%s1154_s17 + $0x40] sm:$0xff]   ;;  %p995_p12 = pnand %p994_p11, %p1128_p5 }
  0x1e   : > { %v986_v16 = vld [vmem:[%s1154_s17 + $0x48] sm:$0xff]   ;;  %v987_v17 = vld [vmem:[%s1154_s17 + $0x50] sm:$0xff]   ;;  %v988_v18 = vld [vmem:[%s1154_s17 + $0x58] sm:$0xff]  }
  0x1f   : > { %v989_v19 = vld [vmem:[%s1154_s17 + $0x60] sm:$0xff]   ;;  %v990_v20 = vld [vmem:[%s1154_s17 + $0x68] sm:$0xff]   ;;  %v991_v21 = vld [vmem:[%s1154_s17 + $0x70] sm:$0xff]   ;;  %p996_p13 = pneg %p995_p12 }
  0x20   : > { %v992_v22 = vld [vmem:[%s1154_s17 + $0x78] sm:$0xff]   ;;  %s999_s17 = scalar_lea.vmem %s998_s16, 64 }
  0x21   : > { %p1001_p1 = scmp.lt.s32.totalorder %s999_s17, %s993_s14 }
  0x23   : > { %p1002_p2 = por %p1001_p1, %p1000_p0 }
  0x24   : > { %909 = vmatmul.mubr.msk.bf16.gmra.mrb[4].mxu0 %vm369_vm1, %v978_v8 }
  0x25   : > { %477 = vmatprep.mubr.bf16.mxu0 %v1057_v3  ;;  %p1003_p3 = pnand %p1002_p2, %p996_p13 }
  0x2c   : > { %910 = vmatmul.mubr.msk.bf16.gmra.mrb[8].mxu0 %vm369_vm1, %v979_v9 }
  0x2d   : > { %487 = vmatprep.mubr.bf16.mxu0 %v1057_v3 }
  0x34   : > { %911 = vmatmul.mubr.msk.bf16.gmra.mrb[12].mxu0 %vm369_vm1, %v980_v10 }
  0x35   : > { %497 = vmatprep.mubr.bf16.mxu0 %v1057_v3 }
  0x3c   : > { %912 = vmatmul.mubr.msk.bf16.gmra.mrb[16].mxu0 %vm369_vm1, %v981_v11 }
  0x3d   : > { %507 = vmatprep.mubr.bf16.mxu0 %v1057_v3 }
  0x44   : > { %913 = vmatmul.mubr.msk.bf16.gmra.mrb[20].mxu0 %vm369_vm1, %v982_v12 }
  0x45   : > { %517 = vmatprep.mubr.bf16.mxu0 %v1057_v3 }
  0x4c   : > { %914 = vmatmul.mubr.msk.bf16.gmra.mrb[24].mxu0 %vm369_vm1, %v983_v13 }
  0x4d   : > { %527 = vmatprep.mubr.bf16.mxu0 %v1057_v3 }
  0x54   : > { %915 = vmatmul.mubr.msk.bf16.gmra.mrb[28].mxu0 %vm369_vm1, %v984_v14 }
  0x55   : > { %537 = vmatprep.mubr.bf16.mxu0 %v1057_v3 }
  0x5c   : > { %916 = vmatmul.mubr.msk.bf16.gmra.mrb[32].mxu0 %vm369_vm1, %v985_v15 }
  0x5d   : > { %547 = vmatprep.mubr.bf16.mxu0 %v1057_v3 }
  0x64   : > { %917 = vmatmul.mubr.msk.bf16.gmra.mrb[36].mxu0 %vm369_vm1, %v986_v16 }
  0x65   : > { %557 = vmatprep.mubr.bf16.mxu0 %v1057_v3 }
  0x6c   : > { %918 = vmatmul.mubr.msk.bf16.gmra.mrb[40].mxu0 %vm369_vm1, %v987_v17 }
  0x6d   : > { %567 = vmatprep.mubr.bf16.mxu0 %v1057_v3 }
  0x74   : > { %919 = vmatmul.mubr.msk.bf16.gmra.mrb[44].mxu0 %vm369_vm1, %v988_v18 }
  0x75   : > { %577 = vmatprep.mubr.bf16.mxu0 %v1057_v3 }
  0x7c   : > { %920 = vmatmul.mubr.msk.bf16.gmra.mrb[48].mxu0 %vm369_vm1, %v989_v19 }
  0x7d   : > { %587 = vmatprep.mubr.bf16.mxu0 %v1057_v3 }
  0x84   : > { %921 = vmatmul.mubr.msk.bf16.gmra.mrb[52].mxu0 %vm369_vm1, %v990_v20 }
  0x85   : > { %597 = vmatprep.mubr.bf16.mxu0 %v1057_v3 }
  0x8c   : > { %922 = vmatmul.mubr.msk.bf16.gmra.mrb[56].mxu0 %vm369_vm1, %v991_v21 }
  0x8d   : > { %607 = vmatprep.mubr.bf16.mxu0 %v1057_v3 }
  0x94   : > { %923 = vmatmul.mubr.msk.bf16.gmra.mrb[60].mxu0 %vm369_vm1, %v992_v22 }
  0xef   : > { %v459_v30 = vpop.f32.mrb[0].mxu0 }
  0xf0   : > { %v460_v31 = vadd.f32 %v459_v30, %v1192_v28  ;;  %v461_v32 = vpop.f32.mrb[1].mxu0 }
  0xf1   : > { %v462_v35 = vadd.f32 %v461_v32, %v1194_v29  ;;  %v463_v36 = vpop.f32.mrb[2].mxu0 }
  0xf2   : > { %v464_v37 = vadd.f32 %v463_v36, %v1192_v28  ;;  %v465_v38 = vpop.f32.mrb[3].mxu0  ;;  %v618_v43 = vmax.f32 %v460_v31, 0.0 }
  0xf3   : > { %v466_v41 = vadd.f32 %v465_v38, %v1194_v29  ;;  %v619_v46 = vmax.f32 %v462_v35, 0.0 }
  0xf4   : > { %v620_v44 = vmax.f32 %v464_v37, 0.0 }
  0xf5   : > { %v621_v47 = vmax.f32 %v466_v41, 0.0 }
  0xf6   : > { %v683_v48 = vpack.c.bf16 %v620_v44, %v618_v43 }
  0xf7   : > { %v469_v50 = vpop.f32.mrb[4].mxu0  ;;  %v684_v51 = vpack.c.bf16 %v621_v47, %v619_v46 }
  0xf8   : > { %v470_v52 = vadd.f32 %v469_v50, %v1192_v28  ;;  %v471_v53 = vpop.f32.mrb[5].mxu0 }
  0xf9   : > { %v472_v54 = vadd.f32 %v471_v53, %v1194_v29  ;;  %v473_v55 = vpop.f32.mrb[6].mxu0  ;;  %742 = vmatprep.subr.bf16.mxu1 %v684_v51 }
  0xfa   : > { %v474_v56 = vadd.f32 %v473_v55, %v1192_v28  ;;  %v475_v57 = vpop.f32.mrb[7].mxu0  ;;  %743 = vmatpush1.bf16.xpose.msra.mxu1 %v683_v48  ;;  %v622_v59 = vmax.f32 %v470_v52, 0.0 }
  0xfb   : > { %v476_v58 = vadd.f32 %v475_v57, %v1194_v29  ;;  %v623_v61 = vmax.f32 %v472_v54, 0.0 }
  0xfc   : > { %v624_v60 = vmax.f32 %v474_v56, 0.0 }
  0xfd   : > { %v625_v62 = vmax.f32 %v476_v58, 0.0 }
  0xfe   : > { %v685_v63 = vpack.c.bf16 %v624_v60, %v622_v59 }
  0xff   : > { %v686_v0 = vpack.c.bf16 %v625_v62, %v623_v61  ;;  %v479_v1 = vpop.f32.mrb[8].mxu0 }
 0x100   : > { %v480_v2 = vadd.f32 %v479_v1, %v1192_v28  ;;  %v481_v3 = vpop.f32.mrb[9].mxu0 }
 0x101   : > { %v482_v4 = vadd.f32 %v481_v3, %v1194_v29  ;;  %v483_v5 = vpop.f32.mrb[10].mxu0  ;;  %744 = vmatprep.subr.bf16.mxu1 %v686_v0 }
 0x102   : > { %v484_v6 = vadd.f32 %v483_v5, %v1192_v28  ;;  %v485_v7 = vpop.f32.mrb[11].mxu0  ;;  %745 = vmatpush1.bf16.xpose.msra.mxu1 %v685_v63  ;;  %v626_v9 = vmax.f32 %v480_v2, 0.0 }
 0x103   : > { %v486_v8 = vadd.f32 %v485_v7, %v1194_v29  ;;  %v627_v11 = vmax.f32 %v482_v4, 0.0 }
 0x104   : > { %v628_v10 = vmax.f32 %v484_v6, 0.0 }
 0x105   : > { %v629_v12 = vmax.f32 %v486_v8, 0.0 }
 0x106   : > { %v687_v13 = vpack.c.bf16 %v628_v10, %v626_v9 }
 0x107   : > { %v688_v14 = vpack.c.bf16 %v629_v12, %v627_v11  ;;  %v489_v15 = vpop.f32.mrb[12].mxu0 }
 0x108   : > { %v490_v16 = vadd.f32 %v489_v15, %v1192_v28  ;;  %v491_v17 = vpop.f32.mrb[13].mxu0 }
 0x109   : > { %v492_v18 = vadd.f32 %v491_v17, %v1194_v29  ;;  %v493_v19 = vpop.f32.mrb[14].mxu0  ;;  %746 = vmatprep.subr.bf16.mxu1 %v688_v14 }
 0x10a   : > { %v494_v20 = vadd.f32 %v493_v19, %v1192_v28  ;;  %v495_v21 = vpop.f32.mrb[15].mxu0  ;;  %747 = vmatpush1.bf16.xpose.msra.mxu1 %v687_v13  ;;  %v630_v24 = vmax.f32 %v490_v16, 0.0 }
 0x10b   : > { %v496_v22 = vadd.f32 %v495_v21, %v1194_v29  ;;  %v631_v26 = vmax.f32 %v492_v18, 0.0 }
 0x10c   : > { %v632_v25 = vmax.f32 %v494_v20, 0.0 }
 0x10d   : > { %v633_v27 = vmax.f32 %v496_v22, 0.0 }
 0x10e   : > { %v689_v30 = vpack.c.bf16 %v632_v25, %v630_v24 }
 0x10f   : > { %v690_v31 = vpack.c.bf16 %v633_v27, %v631_v26  ;;  %v499_v32 = vpop.f32.mrb[16].mxu0 }
 0x110   : > { %v500_v33 = vadd.f32 %v499_v32, %v1192_v28  ;;  %v501_v34 = vpop.f32.mrb[17].mxu0 }
 0x111   : > { %v502_v35 = vadd.f32 %v501_v34, %v1194_v29  ;;  %v503_v36 = vpop.f32.mrb[18].mxu0  ;;  %748 = vmatprep.subr.bf16.mxu1 %v690_v31 }
 0x112   : > { %v504_v37 = vadd.f32 %v503_v36, %v1192_v28  ;;  %v505_v38 = vpop.f32.mrb[19].mxu0  ;;  %749 = vmatpush1.bf16.xpose.msra.mxu1 %v689_v30  ;;  %v634_v41 = vmax.f32 %v500_v33, 0.0 }
 0x113   : > { %v506_v40 = vadd.f32 %v505_v38, %v1194_v29  ;;  %v635_v43 = vmax.f32 %v502_v35, 0.0 }
 0x114   : > { %v636_v42 = vmax.f32 %v504_v37, 0.0 }
 0x115   : > { %v637_v44 = vmax.f32 %v506_v40, 0.0 }
 0x116   : > { %v691_v46 = vpack.c.bf16 %v636_v42, %v634_v41 }
 0x117   : > { %v692_v47 = vpack.c.bf16 %v637_v44, %v635_v43  ;;  %v509_v48 = vpop.f32.mrb[20].mxu0 }
 0x118   : > { %v510_v49 = vadd.f32 %v509_v48, %v1192_v28  ;;  %v511_v50 = vpop.f32.mrb[21].mxu0 }
 0x119   : > { %v512_v51 = vadd.f32 %v511_v50, %v1194_v29  ;;  %v513_v52 = vpop.f32.mrb[22].mxu0  ;;  %750 = vmatprep.subr.bf16.mxu1 %v692_v47 }
 0x11a   : > { %v514_v53 = vadd.f32 %v513_v52, %v1192_v28  ;;  %v515_v54 = vpop.f32.mrb[23].mxu0  ;;  %751 = vmatpush1.bf16.xpose.msra.mxu1 %v691_v46  ;;  %v638_v56 = vmax.f32 %v510_v49, 0.0 }
 0x11b   : > { %v516_v55 = vadd.f32 %v515_v54, %v1194_v29  ;;  %v639_v58 = vmax.f32 %v512_v51, 0.0 }
 0x11c   : > { %v640_v57 = vmax.f32 %v514_v53, 0.0 }
 0x11d   : > { %v641_v59 = vmax.f32 %v516_v55, 0.0 }
 0x11e   : > { %v693_v60 = vpack.c.bf16 %v640_v57, %v638_v56 }
 0x11f   : > { %v694_v61 = vpack.c.bf16 %v641_v59, %v639_v58  ;;  %v519_v62 = vpop.f32.mrb[24].mxu0 }
 0x120   : > { %v520_v63 = vadd.f32 %v519_v62, %v1192_v28  ;;  %v521_v0 = vpop.f32.mrb[25].mxu0 }
 0x121   : > { %v522_v1 = vadd.f32 %v521_v0, %v1194_v29  ;;  %v523_v2 = vpop.f32.mrb[26].mxu0  ;;  %752 = vmatprep.subr.bf16.mxu1 %v694_v61 }
 0x122   : > { %v524_v3 = vadd.f32 %v523_v2, %v1192_v28  ;;  %v525_v4 = vpop.f32.mrb[27].mxu0  ;;  %753 = vmatpush1.bf16.xpose.msra.mxu1 %v693_v60  ;;  %v642_v6 = vmax.f32 %v520_v63, 0.0 }
 0x123   : > { %v526_v5 = vadd.f32 %v525_v4, %v1194_v29  ;;  %v643_v8 = vmax.f32 %v522_v1, 0.0 }
 0x124   : > { %v644_v7 = vmax.f32 %v524_v3, 0.0 }
 0x125   : > { %v645_v9 = vmax.f32 %v526_v5, 0.0 }
 0x126   : > { %v695_v10 = vpack.c.bf16 %v644_v7, %v642_v6 }
 0x127   : > { %v696_v11 = vpack.c.bf16 %v645_v9, %v643_v8  ;;  %v529_v12 = vpop.f32.mrb[28].mxu0 }
 0x128   : > { %v530_v13 = vadd.f32 %v529_v12, %v1192_v28  ;;  %v531_v14 = vpop.f32.mrb[29].mxu0 }
 0x129   : > { %v532_v15 = vadd.f32 %v531_v14, %v1194_v29  ;;  %v533_v16 = vpop.f32.mrb[30].mxu0  ;;  %754 = vmatprep.subr.bf16.mxu1 %v696_v11 }
 0x12a   : > { %v534_v17 = vadd.f32 %v533_v16, %v1192_v28  ;;  %v535_v18 = vpop.f32.mrb[31].mxu0  ;;  %755 = vmatpush1.bf16.xpose.msra.mxu1 %v695_v10  ;;  %v646_v20 = vmax.f32 %v530_v13, 0.0 }
 0x12b   : > { %v536_v19 = vadd.f32 %v535_v18, %v1194_v29  ;;  %v647_v22 = vmax.f32 %v532_v15, 0.0 }
 0x12c   : > { %v648_v21 = vmax.f32 %v534_v17, 0.0 }
 0x12d   : > { %v649_v24 = vmax.f32 %v536_v19, 0.0 }
 0x12e   : > { %v697_v25 = vpack.c.bf16 %v648_v21, %v646_v20 }
 0x12f   : > { %v698_v26 = vpack.c.bf16 %v649_v24, %v647_v22  ;;  %v539_v27 = vpop.f32.mrb[32].mxu0 }
 0x130   : > { %v540_v30 = vadd.f32 %v539_v27, %v1192_v28  ;;  %v541_v31 = vpop.f32.mrb[33].mxu0 }
 0x131   : > { %v542_v32 = vadd.f32 %v541_v31, %v1194_v29  ;;  %v543_v33 = vpop.f32.mrb[34].mxu0  ;;  %756 = vmatprep.subr.bf16.mxu1 %v698_v26 }
 0x132   : > { %v544_v34 = vadd.f32 %v543_v33, %v1192_v28  ;;  %v545_v35 = vpop.f32.mrb[35].mxu0  ;;  %757 = vmatpush1.bf16.xpose.msra.mxu1 %v697_v25  ;;  %v650_v37 = vmax.f32 %v540_v30, 0.0 }
 0x133   : > { %v546_v36 = vadd.f32 %v545_v35, %v1194_v29  ;;  %v651_v40 = vmax.f32 %v542_v32, 0.0 }
 0x134   : > { %v652_v38 = vmax.f32 %v544_v34, 0.0 }
 0x135   : > { %v653_v41 = vmax.f32 %v546_v36, 0.0 }
 0x136   : > { %v699_v42 = vpack.c.bf16 %v652_v38, %v650_v37 }
 0x137   : > { %v700_v43 = vpack.c.bf16 %v653_v41, %v651_v40  ;;  %v549_v44 = vpop.f32.mrb[36].mxu0 }
 0x138   : > { %v550_v46 = vadd.f32 %v549_v44, %v1192_v28  ;;  %v551_v47 = vpop.f32.mrb[37].mxu0 }
 0x139   : > { %v552_v48 = vadd.f32 %v551_v47, %v1194_v29  ;;  %v553_v49 = vpop.f32.mrb[38].mxu0  ;;  %758 = vmatprep.subr.bf16.mxu1 %v700_v43 }
 0x13a   : > { %v554_v50 = vadd.f32 %v553_v49, %v1192_v28  ;;  %v555_v51 = vpop.f32.mrb[39].mxu0  ;;  %759 = vmatpush1.bf16.xpose.msra.mxu1 %v699_v42  ;;  %v654_v53 = vmax.f32 %v550_v46, 0.0 }
 0x13b   : > { %v556_v52 = vadd.f32 %v555_v51, %v1194_v29  ;;  %v655_v55 = vmax.f32 %v552_v48, 0.0 }
 0x13c   : > { %v656_v54 = vmax.f32 %v554_v50, 0.0 }
 0x13d   : > { %v657_v56 = vmax.f32 %v556_v52, 0.0 }
 0x13e   : > { %v701_v57 = vpack.c.bf16 %v656_v54, %v654_v53 }
 0x13f   : > { %v702_v58 = vpack.c.bf16 %v657_v56, %v655_v55  ;;  %v559_v59 = vpop.f32.mrb[40].mxu0 }
 0x140   : > { %v560_v60 = vadd.f32 %v559_v59, %v1192_v28  ;;  %v561_v61 = vpop.f32.mrb[41].mxu0 }
 0x141   : > { %v562_v62 = vadd.f32 %v561_v61, %v1194_v29  ;;  %v563_v63 = vpop.f32.mrb[42].mxu0  ;;  %760 = vmatprep.subr.bf16.mxu1 %v702_v58 }
 0x142   : > { %v564_v0 = vadd.f32 %v563_v63, %v1192_v28  ;;  %v565_v1 = vpop.f32.mrb[43].mxu0  ;;  %761 = vmatpush1.bf16.xpose.msra.mxu1 %v701_v57  ;;  %v658_v3 = vmax.f32 %v560_v60, 0.0 }
 0x143   : > { %v566_v2 = vadd.f32 %v565_v1, %v1194_v29  ;;  %v659_v5 = vmax.f32 %v562_v62, 0.0 }
 0x144   : > { %v660_v4 = vmax.f32 %v564_v0, 0.0 }
 0x145   : > { %v661_v6 = vmax.f32 %v566_v2, 0.0 }
 0x146   : > { %v703_v7 = vpack.c.bf16 %v660_v4, %v658_v3 }
 0x147   : > { %v704_v8 = vpack.c.bf16 %v661_v6, %v659_v5  ;;  %v569_v9 = vpop.f32.mrb[44].mxu0 }
 0x148   : > { %v570_v10 = vadd.f32 %v569_v9, %v1192_v28  ;;  %v571_v11 = vpop.f32.mrb[45].mxu0 }
 0x149   : > { %v572_v12 = vadd.f32 %v571_v11, %v1194_v29  ;;  %v573_v13 = vpop.f32.mrb[46].mxu0  ;;  %762 = vmatprep.subr.bf16.mxu1 %v704_v8 }
 0x14a   : > { %v574_v14 = vadd.f32 %v573_v13, %v1192_v28  ;;  %v575_v15 = vpop.f32.mrb[47].mxu0  ;;  %763 = vmatpush1.bf16.xpose.msra.mxu1 %v703_v7  ;;  %v662_v17 = vmax.f32 %v570_v10, 0.0 }
 0x14b   : > { %v576_v16 = vadd.f32 %v575_v15, %v1194_v29  ;;  %v663_v19 = vmax.f32 %v572_v12, 0.0 }
 0x14c   : > { %v664_v18 = vmax.f32 %v574_v14, 0.0 }
 0x14d   : > { %v665_v20 = vmax.f32 %v576_v16, 0.0 }
 0x14e   : > { %v705_v21 = vpack.c.bf16 %v664_v18, %v662_v17 }
 0x14f   : > { %v706_v22 = vpack.c.bf16 %v665_v20, %v663_v19  ;;  %v579_v24 = vpop.f32.mrb[48].mxu0  ;;  %v732_v20 = vrot.slane %v1202_v39, %v1207_v45 }
 0x150   : > { %v580_v25 = vadd.f32 %v579_v24, %v1192_v28  ;;  %v581_v26 = vpop.f32.mrb[49].mxu0 }
 0x151   : > { %v582_v27 = vadd.f32 %v581_v26, %v1194_v29  ;;  %v583_v30 = vpop.f32.mrb[50].mxu0  ;;  %764 = vmatprep.subr.bf16.mxu1 %v706_v22 }
 0x152   : > { %v584_v31 = vadd.f32 %v583_v30, %v1192_v28  ;;  %v585_v32 = vpop.f32.mrb[51].mxu0  ;;  %765 = vmatpush1.bf16.xpose.msra.mxu1 %v705_v21  ;;  %v666_v34 = vmax.f32 %v580_v25, 0.0 }
 0x153   : > { %v586_v33 = vadd.f32 %v585_v32, %v1194_v29  ;;  %v667_v36 = vmax.f32 %v582_v27, 0.0 }
 0x154   : > { %v668_v35 = vmax.f32 %v584_v31, 0.0 }
 0x155   : > { %v669_v37 = vmax.f32 %v586_v33, 0.0 }
 0x156   : > { %v707_v38 = vpack.c.bf16 %v668_v35, %v666_v34 }
 0x157   : > { %v708_v40 = vpack.c.bf16 %v669_v37, %v667_v36  ;;  %v589_v41 = vpop.f32.mrb[52].mxu0 }
 0x158   : > { %v590_v42 = vadd.f32 %v589_v41, %v1192_v28  ;;  %v591_v43 = vpop.f32.mrb[53].mxu0 }
 0x159   : > { %v592_v44 = vadd.f32 %v591_v43, %v1194_v29  ;;  %v593_v46 = vpop.f32.mrb[54].mxu0  ;;  %766 = vmatprep.subr.bf16.mxu1 %v708_v40 }
 0x15a   : > { %v594_v47 = vadd.f32 %v593_v46, %v1192_v28  ;;  %v595_v48 = vpop.f32.mrb[55].mxu0  ;;  %767 = vmatpush1.bf16.xpose.msra.mxu1 %v707_v38  ;;  %v670_v50 = vmax.f32 %v590_v42, 0.0 }
 0x15b   : > { %v596_v49 = vadd.f32 %v595_v48, %v1194_v29  ;;  %v671_v52 = vmax.f32 %v592_v44, 0.0 }
 0x15c   : > { %v672_v51 = vmax.f32 %v594_v47, 0.0 }
 0x15d   : > { %v673_v53 = vmax.f32 %v596_v49, 0.0 }
 0x15e   : > { %v709_v54 = vpack.c.bf16 %v672_v51, %v670_v50 }
 0x15f   : > { %v710_v55 = vpack.c.bf16 %v673_v53, %v671_v52  ;;  %v599_v56 = vpop.f32.mrb[56].mxu0 }
 0x160   : > { %v600_v57 = vadd.f32 %v599_v56, %v1192_v28  ;;  %v601_v58 = vpop.f32.mrb[57].mxu0 }
 0x161   : > { %v602_v59 = vadd.f32 %v601_v58, %v1194_v29  ;;  %v603_v60 = vpop.f32.mrb[58].mxu0  ;;  %768 = vmatprep.subr.bf16.mxu1 %v710_v55 }
 0x162   : > { %v604_v61 = vadd.f32 %v603_v60, %v1192_v28  ;;  %v605_v62 = vpop.f32.mrb[59].mxu0  ;;  %769 = vmatpush1.bf16.xpose.msra.mxu1 %v709_v54  ;;  %v674_v0 = vmax.f32 %v600_v57, 0.0 }
 0x163   : > { %v606_v63 = vadd.f32 %v605_v62, %v1194_v29  ;;  %v675_v2 = vmax.f32 %v602_v59, 0.0 }
 0x164   : > { %v676_v1 = vmax.f32 %v604_v61, 0.0 }
 0x165   : > { %v677_v3 = vmax.f32 %v606_v63, 0.0 }
 0x166   : > { %v711_v4 = vpack.c.bf16 %v676_v1, %v674_v0 }
 0x167   : > { %v712_v5 = vpack.c.bf16 %v677_v3, %v675_v2  ;;  %v609_v6 = vpop.f32.mrb[60].mxu0 }
 0x168   : > { %v610_v7 = vadd.f32 %v609_v6, %v1192_v28  ;;  %v611_v8 = vpop.f32.mrb[61].mxu0 }
 0x169   : > { %v612_v9 = vadd.f32 %v611_v8, %v1194_v29  ;;  %v613_v10 = vpop.f32.mrb[62].mxu0  ;;  %770 = vmatprep.subr.bf16.mxu1 %v712_v5 }
 0x16a   : > { %v614_v11 = vadd.f32 %v613_v10, %v1192_v28  ;;  %v615_v12 = vpop.f32.mrb[63].mxu0  ;;  %771 = vmatpush1.bf16.xpose.msra.mxu1 %v711_v4  ;;  %v678_v14 = vmax.f32 %v610_v7, 0.0  ;;  %v716_v28 = vstv %s715_s26 }
 0x16b   : > { %v616_v13 = vadd.f32 %v615_v12, %v1194_v29  ;;  %v679_v16 = vmax.f32 %v612_v9, 0.0 }
 0x16c   : > { %v680_v15 = vmax.f32 %v614_v11, 0.0 }
 0x16d   : > { %v681_v17 = vmax.f32 %v616_v13, 0.0 }
 0x16e   : > { %v713_v18 = vpack.c.bf16 %v680_v15, %v678_v14 }
 0x16f   : > { %v714_v19 = vpack.c.bf16 %v681_v17, %v679_v16 }
 0x171   : > { %772 = vmatprep.subr.bf16.mxu1 %v714_v19 }
 0x172   : > { %773 = vmatpush1.bf16.xpose.msra.mxu1 %v713_v18 }
 0x179   : > { %775 = vmatmul.mubr.bf16.vlgmr.msra.gmra.mrb[0].mxu1 %v732_v20 }
 0x24c   : > { %v776_v21 = vpop.f32.mrb[0].mxu1 }
 0x24d   : > { %v777_v22 = vadd.f32 %v776_v21, %v716_v28  ;;  %v778_v29 = vpop.f32.mrb[1].mxu1 }
 0x24e   : > { %v779_v24 = vadd.f32 %v778_v29, %v716_v28  ;;  %v780_v25 = vpop.f32.mrb[2].mxu1 }
 0x24f   : > { %v781_v26 = vpop.f32.mrb[3].mxu1 }
 0x250   : > { %v785_v27 = vcombine.low %v777_v22, %v779_v24 }
 0x252   : > { %v792_v30 = vrot.slane %v785_v27, %v1207_v45 }
 0x254   : > { %v799_v39 = vrot.slane %v792_v30, %v1207_v45 }
 0x256   : > { %805 = vst.msk [vmem:[%s219_s7] sm:$0x3] %vm803_vm2, %v799_v39 }
 0x257   : > { %1006 = shalt.err (!%p1003_p3)
}
 0x258   : > { %s1007_s12 = scalar_lea.hbm %s1280_s11, 32  ;;  %s1011_s4 = scalar_lea.hbm %s1327_s5, 64 }
 0x259   : > { %p1008_p4 = scmp.ne.s32.totalorder %s1280_s11, %s1007_s12  ;;  %p1012_p9 = scmp.lt.u32.totalorder %s1280_s11, %s1327_s5 }
 0x25a   : > { %p1013_p10 = scmp.lt.u32.totalorder %s1011_s4, %s1007_s12  ;;  %p1015_p12 = scmp.lt.u32.totalorder %s1007_s12, %s1280_s11 }
 0x25b   : > { %p1009_p7 = pnand %p1008_p4, %p1128_p5 }
 0x25c   : > { %p1014_p11 = por %p1013_p10, %p1012_p9 }
 0x25d   : > { %p1010_p8 = pneg %p1009_p7 }
 0x25e   : > { %p1016_p13 = por %p1015_p12, %p1014_p11 }
 0x260   : > { %p1017_p0 = pnand %p1016_p13, %p1010_p8 }
 0x262   : > { %1020 = shalt.err (!%p1017_p0)
}
 0x263   : > { %931 = dma.vmem_to_hbm [thread:$0]  (%p1128_p5), %s1282_s8, 32, %s1280_s11, %s807_s13  }
 0x264 PF: > { %p937_p1 = scmp.ge.s32.totalorder %s1055_s23, 2  ;;  %s833_s27 = sand.u32 1, %s1043_s20  }
 0x265   : > { %s834_s6 = scalar_lea.sflag [#allocation4], %s833_s27 }
 0x266   : > { %p934_p2 = pnand %p937_p1, %p1132_p6 }
 0x268   : > { %1038 = dma.done.wait (!%p934_p2), %s834_s6, 32  }
 0x269   : > { %1040 = vsyncadd (!%p934_p2), %s834_s6, 4294967264  ;;  %p16_p3 = scmp.ge.s32.totalorder %s1116_s25, 4   ;;  %s1330_s20 = smov %s1047_s21 }
 0x26a   : > { %s1331_s21 = smov %s1051_s22  ;;  %s1332_s22 = smov %s1126_s28 }
 0x26b   : > { %s1333_s23 = smov %s1116_s25  ;;  %18 = sbr.rel (!%p16_p3) target bundleno = 5 (0x5), region = 75 }
 0x272   :  { %839 = vsyncpa [#allocation4], 1 }
 0x273   :  { %841 = vsyncpa [#allocation4 + $0x1], 1 }

</bundles_post_ra>
